<compile_context>
chip_gen: v7x
topology: tpu7x:2x2x1
jax: 0.10.0
libtpu: 0.0.40
codegen_flags: <defaults>
</compile_context>

<pallas_src>
import jax
import jax.numpy as jnp
from jax.experimental import pallas as pl
from jax.experimental.pallas import tpu as pltpu


HIDDEN = 250
HIDDEN_PAD = 256       # 250 padded to 2x128 lanes
OUT = 88
OUT_PAD = 128          # 88 padded to one full 128-lane tile
LANE = 128
SUBLANE = 8


def _round_up(n, m):
    return (n + m - 1) // m * m


def dnn_kernel(x_ref,
               w1_ref, b1_ref,
               w2_ref, b2_ref,
               w3_ref, b3_ref,
               w4_ref, b4_ref,
               o_ref):
    # hidden1: Linear(inputNode, 250)   (Dropout -> identity in eval)
    h = jnp.dot(x_ref[...], w1_ref[...],
                preferred_element_type=jnp.float32) + b1_ref[...]
    # hidden2: Linear(250, 250)
    h = jnp.dot(h.astype(jnp.bfloat16), w2_ref[...],
                preferred_element_type=jnp.float32) + b2_ref[...]
    # hidden3: Linear(250, 250)
    h = jnp.dot(h.astype(jnp.bfloat16), w3_ref[...],
                preferred_element_type=jnp.float32) + b3_ref[...]
    # out: Linear(250, 88) + Sigmoid  (epilogue stays f32)
    logits = jnp.dot(h.astype(jnp.bfloat16), w4_ref[...],
                     preferred_element_type=jnp.float32) + b4_ref[...]
    o_ref[...] = jax.nn.sigmoid(logits)


def dnn_forward(x, packed, *, tb=256):
    """x: [B, inputNode] f32.  packed: padded/bf16 params from pack_params."""
    B, F = x.shape
    in_pad = packed["w1"].shape[0]
    assert F <= in_pad, "input feature dim larger than packed weights"

    # Pick a batch tile: at most `tb` rows, at least a full sublane group.
    TB = min(tb, _round_up(max(B, 1), SUBLANE))
    B_pad = _round_up(B, TB)
    grid_n = B_pad // TB

    # Zero-pad batch + features and cast the activation operand to bf16.
    xp = jnp.zeros((B_pad, in_pad), jnp.bfloat16)
    xp = xp.at[:B, :F].set(x.astype(jnp.bfloat16))

    w1, b1 = packed["w1"], packed["b1"]
    w2, b2 = packed["w2"], packed["b2"]
    w3, b3 = packed["w3"], packed["b3"]
    w4, b4 = packed["w4"], packed["b4"]

    def resident(a):  # weights/biases: same block every grid step (VMEM-resident)
        return pl.BlockSpec(a.shape, lambda i: (0,) * a.ndim)

    flops = 2 * B_pad * (in_pad * HIDDEN_PAD
                         + 2 * HIDDEN_PAD * HIDDEN_PAD
                         + HIDDEN_PAD * OUT_PAD)
    weight_bytes = sum(int(a.size) * a.dtype.itemsize
                       for a in (w1, b1, w2, b2, w3, b3, w4, b4))
    bytes_accessed = int(xp.size) * 2 + weight_bytes + B_pad * OUT_PAD * 4

    out_pad = pl.pallas_call(
        dnn_kernel,
        out_shape=jax.ShapeDtypeStruct((B_pad, OUT_PAD), jnp.float32),
        grid=(grid_n,),
        in_specs=[pl.BlockSpec((TB, in_pad), lambda i: (i, 0)),
                  resident(w1), resident(b1),
                  resident(w2), resident(b2),
                  resident(w3), resident(b3),
                  resident(w4), resident(b4)],
        out_specs=pl.BlockSpec((TB, OUT_PAD), lambda i: (i, 0)),
        compiler_params=pltpu.CompilerParams(
            dimension_semantics=("parallel",),
            vmem_limit_bytes=32 * 1024 * 1024),
        cost_estimate=pl.CostEstimate(
            flops=flops,
            transcendentals=B_pad * OUT_PAD,
            bytes_accessed=bytes_accessed),
    )(xp, w1, b1, w2, b2, w3, b3, w4, b4)

    # Drop batch padding and the padded output lanes (they hold sigmoid(0)=0.5).
    return out_pad[:B, :OUT]


def init_params(key, input_node):
    """Deterministic init mimicking nn.Linear default (uniform ±1/sqrt(fan_in)).
    Weights stored as [in, out] (transposed vs. PyTorch's [out, in]), f32."""
    ks = jax.random.split(key, 8)

    def linear(kw, kb, fan_in, fan_out):
        bound = 1.0 / jnp.sqrt(jnp.float32(fan_in))
        w = jax.random.uniform(kw, (fan_in, fan_out), jnp.float32, -bound, bound)
        b = jax.random.uniform(kb, (1, fan_out), jnp.float32, -bound, bound)
        return w, b

    w1, b1 = linear(ks[0], ks[1], input_node, HIDDEN)
    w2, b2 = linear(ks[2], ks[3], HIDDEN, HIDDEN)
    w3, b3 = linear(ks[4], ks[5], HIDDEN, HIDDEN)
    w4, b4 = linear(ks[6], ks[7], HIDDEN, OUT)
    return {"w1": w1, "b1": b1, "w2": w2, "b2": b2,
            "w3": w3, "b3": b3, "w4": w4, "b4": b4}


def pack_params(params, input_node):
    """Zero-pad weights/biases to lane-aligned shapes; weights -> bf16, biases f32."""
    in_pad = _round_up(input_node, LANE)

    def pad_w(w, rows, cols):
        wp = jnp.zeros((rows, cols), jnp.float32)
        wp = wp.at[:w.shape[0], :w.shape[1]].set(w)
        return wp.astype(jnp.bfloat16)

    def pad_b(b, cols):
        bp = jnp.zeros((1, cols), jnp.float32)
        return bp.at[:, :b.shape[1]].set(b)

    return {
        "w1": pad_w(params["w1"], in_pad, HIDDEN_PAD), "b1": pad_b(params["b1"], HIDDEN_PAD),
        "w2": pad_w(params["w2"], HIDDEN_PAD, HIDDEN_PAD), "b2": pad_b(params["b2"], HIDDEN_PAD),
        "w3": pad_w(params["w3"], HIDDEN_PAD, HIDDEN_PAD), "b3": pad_b(params["b3"], HIDDEN_PAD),
        "w4": pad_w(params["w4"], HIDDEN_PAD, OUT_PAD), "b4": pad_b(params["b4"], OUT_PAD),
    }


def reference_forward_f32(x, p):
    """Full-precision f32 reference on the original (unpadded) params."""
    h = x @ p["w1"] + p["b1"]
    h = h @ p["w2"] + p["b2"]
    h = h @ p["w3"] + p["b3"]
    return jax.nn.sigmoid(h @ p["w4"] + p["b4"])


def reference_forward_bf16(x, packed, input_node):
    """Mirror of the kernel's dtype path (bf16 operands, f32 accumulation)."""
    in_pad = packed["w1"].shape[0]
    xp = jnp.zeros((x.shape[0], in_pad), jnp.bfloat16).at[:, :input_node].set(
        x.astype(jnp.bfloat16))
    h = jnp.dot(xp, packed["w1"], preferred_element_type=jnp.float32) + packed["b1"]
    h = jnp.dot(h.astype(jnp.bfloat16), packed["w2"],
                preferred_element_type=jnp.float32) + packed["b2"]
    h = jnp.dot(h.astype(jnp.bfloat16), packed["w3"],
                preferred_element_type=jnp.float32) + packed["b3"]
    logits = jnp.dot(h.astype(jnp.bfloat16), packed["w4"],
                     preferred_element_type=jnp.float32) + packed["b4"]
    return jax.nn.sigmoid(logits)[:, :OUT]


if __name__ == "__main__":
    key = jax.random.PRNGKey(0)
    k_x, k_p = jax.random.split(key)

    batch, input_node = 8, 32
    x = jax.random.normal(k_x, (batch, input_node), jnp.float32)
    params = init_params(k_p, input_node)
    packed = pack_params(params, input_node)

    out = dnn_forward(x, packed)
    out = jax.block_until_ready(out)
    assert out.shape == (batch, OUT)

    # Tight check against a reference that mirrors the kernel's bf16/f32 path.
    ref_bf16 = reference_forward_bf16(x, packed, input_node)
    assert jnp.allclose(out, ref_bf16, atol=1e-3, rtol=1e-3), \
        "mismatch vs bf16-mirrored reference"

    # Loose check against the full-f32 reference (bf16 operand rounding only).
    ref_f32 = reference_forward_f32(x, params)
    assert jnp.allclose(out, ref_f32, atol=2e-2, rtol=2e-2), \
        "mismatch vs f32 reference"

    print("KERNEL_OK")
</pallas_src>

<mosaic_0001>
module attributes {stable_mosaic.version = 11 : i64} {
  func.func @dnn_kernel(%arg0: i32, %arg1: memref<8x128xbf16, #tpu.memory_space<vmem>>, %arg2: memref<128x256xbf16, #tpu.memory_space<vmem>>, %arg3: memref<1x256xf32, #tpu.memory_space<vmem>>, %arg4: memref<256x256xbf16, #tpu.memory_space<vmem>>, %arg5: memref<1x256xf32, #tpu.memory_space<vmem>>, %arg6: memref<256x256xbf16, #tpu.memory_space<vmem>>, %arg7: memref<1x256xf32, #tpu.memory_space<vmem>>, %arg8: memref<256x128xbf16, #tpu.memory_space<vmem>>, %arg9: memref<1x128xf32, #tpu.memory_space<vmem>>, %arg10: memref<8x128xf32, #tpu.memory_space<vmem>>) attributes {dimension_semantics = [#tpu.dimension_semantics<parallel>], iteration_bounds = array<i64: 1>, scalar_prefetch = 0 : i64, scratch_operands = 0 : i64, tpu.core_type = #tpu.core_type<tc>, window_params = [{transform_indices = @transform_0, window_bounds = array<i64: 8, 128>}, {pipeline_mode = #tpu.pipeline_mode<synchronous>, transform_indices = @transform_1, window_bounds = array<i64: 128, 256>}, {pipeline_mode = #tpu.pipeline_mode<synchronous>, transform_indices = @transform_2, window_bounds = array<i64: 1, 256>}, {pipeline_mode = #tpu.pipeline_mode<synchronous>, transform_indices = @transform_3, window_bounds = array<i64: 256, 256>}, {pipeline_mode = #tpu.pipeline_mode<synchronous>, transform_indices = @transform_4, window_bounds = array<i64: 1, 256>}, {pipeline_mode = #tpu.pipeline_mode<synchronous>, transform_indices = @transform_5, window_bounds = array<i64: 256, 256>}, {pipeline_mode = #tpu.pipeline_mode<synchronous>, transform_indices = @transform_6, window_bounds = array<i64: 1, 256>}, {pipeline_mode = #tpu.pipeline_mode<synchronous>, transform_indices = @transform_7, window_bounds = array<i64: 256, 128>}, {pipeline_mode = #tpu.pipeline_mode<synchronous>, transform_indices = @transform_8, window_bounds = array<i64: 1, 128>}, {transform_indices = @transform_9, window_bounds = array<i64: 8, 128>}]} {
    %c0 = arith.constant 0 : index
    %c0_0 = arith.constant 0 : index
    %0 = vector.load %arg1[%c0, %c0_0] : memref<8x128xbf16, #tpu.memory_space<vmem>>, vector<8x128xbf16>
    %c0_1 = arith.constant 0 : index
    %c0_2 = arith.constant 0 : index
    %1 = vector.load %arg2[%c0_1, %c0_2] : memref<128x256xbf16, #tpu.memory_space<vmem>>, vector<128x256xbf16>
    %cst = arith.constant dense<0.000000e+00> : vector<8x256xf32>
    %2 = tpu.matmul %0, %1, %cst {dimension_numbers = #tpu.dot_dimension_numbers<[1], [0], [0], [1], [0, 0, 1, 1], [], []>} : vector<8x128xbf16>, vector<128x256xbf16>, vector<8x256xf32> -> vector<8x256xf32>
    %c0_3 = arith.constant 0 : index
    %c0_4 = arith.constant 0 : index
    %3 = vector.load %arg3[%c0_3, %c0_4] : memref<1x256xf32, #tpu.memory_space<vmem>>, vector<1x256xf32>
    %4 = vector.broadcast %3 : vector<1x256xf32> to vector<8x256xf32>
    %5 = arith.addf %2, %4 : vector<8x256xf32>
    %6 = arith.truncf %5 : vector<8x256xf32> to vector<8x256xbf16>
    %c0_5 = arith.constant 0 : index
    %c0_6 = arith.constant 0 : index
    %7 = vector.load %arg4[%c0_5, %c0_6] : memref<256x256xbf16, #tpu.memory_space<vmem>>, vector<256x256xbf16>
    %cst_7 = arith.constant dense<0.000000e+00> : vector<8x256xf32>
    %8 = tpu.matmul %6, %7, %cst_7 {dimension_numbers = #tpu.dot_dimension_numbers<[1], [0], [0], [1], [0, 0, 1, 1], [], []>} : vector<8x256xbf16>, vector<256x256xbf16>, vector<8x256xf32> -> vector<8x256xf32>
    %c0_8 = arith.constant 0 : index
    %c0_9 = arith.constant 0 : index
    %9 = vector.load %arg5[%c0_8, %c0_9] : memref<1x256xf32, #tpu.memory_space<vmem>>, vector<1x256xf32>
    %10 = vector.broadcast %9 : vector<1x256xf32> to vector<8x256xf32>
    %11 = arith.addf %8, %10 : vector<8x256xf32>
    %12 = arith.truncf %11 : vector<8x256xf32> to vector<8x256xbf16>
    %c0_10 = arith.constant 0 : index
    %c0_11 = arith.constant 0 : index
    %13 = vector.load %arg6[%c0_10, %c0_11] : memref<256x256xbf16, #tpu.memory_space<vmem>>, vector<256x256xbf16>
    %cst_12 = arith.constant dense<0.000000e+00> : vector<8x256xf32>
    %14 = tpu.matmul %12, %13, %cst_12 {dimension_numbers = #tpu.dot_dimension_numbers<[1], [0], [0], [1], [0, 0, 1, 1], [], []>} : vector<8x256xbf16>, vector<256x256xbf16>, vector<8x256xf32> -> vector<8x256xf32>
    %c0_13 = arith.constant 0 : index
    %c0_14 = arith.constant 0 : index
    %15 = vector.load %arg7[%c0_13, %c0_14] : memref<1x256xf32, #tpu.memory_space<vmem>>, vector<1x256xf32>
    %16 = vector.broadcast %15 : vector<1x256xf32> to vector<8x256xf32>
    %17 = arith.addf %14, %16 : vector<8x256xf32>
    %18 = arith.truncf %17 : vector<8x256xf32> to vector<8x256xbf16>
    %c0_15 = arith.constant 0 : index
    %c0_16 = arith.constant 0 : index
    %19 = vector.load %arg8[%c0_15, %c0_16] : memref<256x128xbf16, #tpu.memory_space<vmem>>, vector<256x128xbf16>
    %cst_17 = arith.constant dense<0.000000e+00> : vector<8x128xf32>
    %20 = tpu.matmul %18, %19, %cst_17 {dimension_numbers = #tpu.dot_dimension_numbers<[1], [0], [0], [1], [0, 0, 1, 1], [], []>} : vector<8x256xbf16>, vector<256x128xbf16>, vector<8x128xf32> -> vector<8x128xf32>
    %c0_18 = arith.constant 0 : index
    %c0_19 = arith.constant 0 : index
    %21 = vector.load %arg9[%c0_18, %c0_19] : memref<1x128xf32, #tpu.memory_space<vmem>>, vector<1x128xf32>
    %22 = vector.broadcast %21 : vector<1x128xf32> to vector<8x128xf32>
    %23 = arith.addf %20, %22 : vector<8x128xf32>
    %24 = arith.negf %23 : vector<8x128xf32>
    %25 = math.exp %24 : vector<8x128xf32>
    %cst_20 = arith.constant 1.000000e+00 : f32
    %26 = vector.broadcast %cst_20 : f32 to vector<8x128xf32>
    %27 = arith.addf %26, %25 : vector<8x128xf32>
    %28 = arith.divf %26, %27 : vector<8x128xf32>
    %c0_21 = arith.constant 0 : index
    %c0_22 = arith.constant 0 : index
    %29 = vector.load %arg10[%c0_21, %c0_22] : memref<8x128xf32, #tpu.memory_space<vmem>>, vector<8x128xf32>
    tpu.vector_store %arg10[%c0_21, %c0_22], %28 {strides = array<i32>} : memref<8x128xf32, #tpu.memory_space<vmem>>, vector<8x128xf32>,
    return
  }
  func.func @transform_0(%arg0: i32) -> (i32, i32) {
    %c0_i32 = arith.constant 0 : i32
    %c0_i32_0 = arith.constant 0 : i32
    return %arg0, %c0_i32 : i32, i32
  }
  func.func @transform_1(%arg0: i32) -> (i32, i32) {
    %c0_i32 = arith.constant 0 : i32
    %c0_i32_0 = arith.constant 0 : i32
    %c0_i32_1 = arith.constant 0 : i32
    return %c0_i32, %c0_i32_0 : i32, i32
  }
  func.func @transform_2(%arg0: i32) -> (i32, i32) {
    %c0_i32 = arith.constant 0 : i32
    %c0_i32_0 = arith.constant 0 : i32
    %c0_i32_1 = arith.constant 0 : i32
    return %c0_i32, %c0_i32_0 : i32, i32
  }
  func.func @transform_3(%arg0: i32) -> (i32, i32) {
    %c0_i32 = arith.constant 0 : i32
    %c0_i32_0 = arith.constant 0 : i32
    %c0_i32_1 = arith.constant 0 : i32
    return %c0_i32, %c0_i32_0 : i32, i32
  }
  func.func @transform_4(%arg0: i32) -> (i32, i32) {
    %c0_i32 = arith.constant 0 : i32
    %c0_i32_0 = arith.constant 0 : i32
    %c0_i32_1 = arith.constant 0 : i32
    return %c0_i32, %c0_i32_0 : i32, i32
  }
  func.func @transform_5(%arg0: i32) -> (i32, i32) {
    %c0_i32 = arith.constant 0 : i32
    %c0_i32_0 = arith.constant 0 : i32
    %c0_i32_1 = arith.constant 0 : i32
    return %c0_i32, %c0_i32_0 : i32, i32
  }
  func.func @transform_6(%arg0: i32) -> (i32, i32) {
    %c0_i32 = arith.constant 0 : i32
    %c0_i32_0 = arith.constant 0 : i32
    %c0_i32_1 = arith.constant 0 : i32
    return %c0_i32, %c0_i32_0 : i32, i32
  }
  func.func @transform_7(%arg0: i32) -> (i32, i32) {
    %c0_i32 = arith.constant 0 : i32
    %c0_i32_0 = arith.constant 0 : i32
    %c0_i32_1 = arith.constant 0 : i32
    return %c0_i32, %c0_i32_0 : i32, i32
  }
  func.func @transform_8(%arg0: i32) -> (i32, i32) {
    %c0_i32 = arith.constant 0 : i32
    %c0_i32_0 = arith.constant 0 : i32
    %c0_i32_1 = arith.constant 0 : i32
    return %c0_i32, %c0_i32_0 : i32, i32
  }
  func.func @transform_9(%arg0: i32) -> (i32, i32) {
    %c0_i32 = arith.constant 0 : i32
    %c0_i32_0 = arith.constant 0 : i32
    return %arg0, %c0_i32 : i32, i32
  }
}

</mosaic_0001>

<bundles_post_ra>
// kernel: tpu_custom_call.1
= control target key start
LH: loop header
LB: loop body
LE: loop exit
PB: predicated region body
PF: predicated region fallthrough
CT: control target
= control target key end

     0   :  { %14 = vsyncpa [#allocation3], 0  ;;  %s1520_s0 = inlined_call_operand.hbm [shape: bf16[8,128], index: 0, kind: input, shape index: {}]   ;;  %s1521_s1 = inlined_call_operand.hbm [shape: bf16[128,256], index: 1, kind: input, shape index: {}]   ;;  %s1522_s2 = inlined_call_operand.vmem [shape: f32[1,256], index: 2, kind: input, shape index: {}]   ;;  %s1523_s3 = inlined_call_operand.hbm [shape: bf16[256,256], index: 3, kind: input, shape index: {}]   ;;  %s1524_s4 = inlined_call_operand.vmem [shape: f32[1,256], index: 4, kind: input, shape index: {}]   ;;  %s1525_s5 = inlined_call_operand.hbm [shape: bf16[256,256], index: 5, kind: input, shape index: {}]   ;;  %s1526_s6 = inlined_call_operand.vmem [shape: f32[1,256], index: 6, kind: input, shape index: {}]   ;;  %s1527_s7 = inlined_call_operand.hbm [shape: bf16[256,128], index: 7, kind: input, shape index: {}]   ;;  %s1528_s8 = inlined_call_operand.vmem [shape: f32[1,128], index: 8, kind: input, shape index: {}]   ;;  %s1529_s9 = inlined_call_operand.hbm [shape: f32[8,128], index: 9, kind: output, shape index: {}]  }
   0x1   :  { %15 = vsyncpa [#allocation6], 0 }
   0x2   :  { %16 = vsyncpa [#allocation9], 0 }
   0x3   :  { %17 = vsyncpa [#allocation4], 0  ;;  %s1356_s30 = smov [#allocation5]   ;;  %s1216_s13 = scalar_lea.hbm %s1521_s1, 2048 }
   0x4   :  { %s33_s10 = sshll.u32 %s1356_s30, 4  ;;  %p1217_p0 = scmp.ne.s32.totalorder %s1521_s1, %s1216_s13  ;;  %s34_s10 = int_to_ptr.vmem [resolvable:$true] %s33_s10 }
   0x5   :  { %p1220_p1 = scmp.lt.u32.totalorder %s1216_s13, %s1521_s1 }
   0x7   :  { %p1222_p2 = pnand %p1220_p1, %p1217_p0 }
   0x9   :  { %1225 = shalt.err (!%p1222_p2)
}
   0xa   :  { %s1226_s18 = scalar_lea.vmem %s34_s10, 2048  ;;  %p1231_p4 = scmp.lt.s32.totalorder %s34_s10, %s34_s10 }
   0xb   :  { %p1227_p3 = scmp.ne.s32.totalorder %s34_s10, %s1226_s18  ;;  %p1232_p5 = scmp.lt.s32.totalorder %s1226_s18, %s1226_s18 }
   0xd   :  { %p1233_p6 = por %p1232_p5, %p1231_p4 }
   0xf   :  { %p1234_p7 = pnand %p1233_p6, %p1227_p3 }
  0x11   :  { %1237 = shalt.err (!%p1234_p7)
}
  0x12   :  { %s1357_s19 = smov 128   ;;  %s1358_s20 = smov 8  }
  0x13   :  { %39 = dma.hbm_to_vmem [thread:$0]  %s1521_s1, 2048, %s34_s10, [#allocation6], %s1357_s19, %s1357_s19, %s1358_s20  }
  0x14   :  { %s1359_s23 = smov [#allocation8]   ;;  %s1360_s25 = smov [#allocation2]  }
  0x15   :  { %s61_s24 = sshll.u32 %s1359_s23, 4  ;;  %s24_s26 = sshll.u32 %s1360_s25, 4  ;;  %s62_s24 = int_to_ptr.vmem [resolvable:$true] %s61_s24  ;;  %s25_s26 = int_to_ptr.vmem [resolvable:$true] %s24_s26 }
  0x16   :  { %s1238_s29 = scalar_lea.hbm %s1525_s5, 4096 }
  0x17   :  { %p1239_p8 = scmp.ne.s32.totalorder %s1525_s5, %s1238_s29  ;;  %p1242_p9 = scmp.lt.u32.totalorder %s1238_s29, %s1525_s5 }
  0x19   :  { %p1244_p10 = pnand %p1242_p9, %p1239_p8 }
  0x1b   :  { %1247 = shalt.err (!%p1244_p10)
}
  0x1c   :  { %s1248_s1 = scalar_lea.vmem %s62_s24, 4096  ;;  %p1253_p12 = scmp.lt.s32.totalorder %s62_s24, %s62_s24 }
  0x1d   :  { %p1249_p11 = scmp.ne.s32.totalorder %s62_s24, %s1248_s1  ;;  %p1254_p13 = scmp.lt.s32.totalorder %s1248_s1, %s1248_s1 }
  0x1f   :  { %p1255_p0 = por %p1254_p13, %p1253_p12 }
  0x21   :  { %p1256_p1 = pnand %p1255_p0, %p1249_p11 }
  0x23   :  { %1259 = shalt.err (!%p1256_p1)
}
  0x24   :  { %67 = dma.hbm_to_vmem [thread:$0]  %s1525_s5, 4096, %s62_s24, [#allocation9], %s1357_s19, %s1357_s19, %s1358_s20  }
  0x25   :  { %s1260_s17 = scalar_lea.hbm %s1520_s0, 64 }
  0x26   :  { %p1261_p2 = scmp.ne.s32.totalorder %s1520_s0, %s1260_s17  ;;  %p1264_p3 = scmp.lt.u32.totalorder %s1260_s17, %s1520_s0 }
  0x28   :  { %p1266_p4 = pnand %p1264_p3, %p1261_p2 }
  0x2a   :  { %1269 = shalt.err (!%p1266_p4)
}
  0x2b   :  { %s1270_s25 = scalar_lea.vmem %s25_s26, 64  ;;  %p1275_p6 = scmp.lt.s32.totalorder %s25_s26, %s25_s26 }
  0x2c   :  { %p1271_p5 = scmp.ne.s32.totalorder %s25_s26, %s1270_s25  ;;  %p1276_p7 = scmp.lt.s32.totalorder %s1270_s25, %s1270_s25 }
  0x2e   :  { %p1277_p8 = por %p1276_p7, %p1275_p6 }
  0x30   :  { %p1278_p9 = pnand %p1277_p8, %p1271_p5 }
  0x32   :  { %1281 = shalt.err (!%p1278_p9)
}
  0x33   :  { %27 = dma.hbm_to_vmem [thread:$0]  %s1520_s0, 64, %s25_s26, [#allocation3]  }
  0x34   :  { %s1361_s27 = smov [#allocation7]   ;;  %s1362_s29 = smov [#allocation10]  }
  0x35   :  { %s47_s28 = sshll.u32 %s1361_s27, 4  ;;  %s75_s30 = sshll.u32 %s1362_s29, 4  ;;  %s48_s28 = int_to_ptr.vmem [resolvable:$true] %s47_s28  ;;  %s76_s30 = int_to_ptr.vmem [resolvable:$true] %s75_s30 }
  0x36   :  { %s1282_s13 = scalar_lea.hbm %s1523_s3, 4096 }
  0x37   :  { %p1283_p10 = scmp.ne.s32.totalorder %s1523_s3, %s1282_s13  ;;  %p1286_p11 = scmp.lt.u32.totalorder %s1282_s13, %s1523_s3 }
  0x39   :  { %p1288_p12 = pnand %p1286_p11, %p1283_p10 }
  0x3b   :  { %1291 = shalt.err (!%p1288_p12)
}
  0x3c   :  { %s1292_s0 = scalar_lea.vmem %s48_s28, 4096  ;;  %p1297_p0 = scmp.lt.s32.totalorder %s48_s28, %s48_s28 }
  0x3d   :  { %p1293_p13 = scmp.ne.s32.totalorder %s48_s28, %s1292_s0  ;;  %p1298_p1 = scmp.lt.s32.totalorder %s1292_s0, %s1292_s0 }
  0x3f   :  { %p1299_p2 = por %p1298_p1, %p1297_p0 }
  0x41   :  { %p1300_p3 = pnand %p1299_p2, %p1293_p13 }
  0x43   :  { %1303 = shalt.err (!%p1300_p3)
}
  0x44   :  { %53 = dma.hbm_to_vmem [thread:$0]  %s1523_s3, 4096, %s48_s28, [#allocation6], %s1357_s19, %s1357_s19, %s1358_s20  }
  0x45   :  { %s1304_s21 = scalar_lea.hbm %s1527_s7, 2048 }
  0x46   :  { %p1305_p4 = scmp.ne.s32.totalorder %s1527_s7, %s1304_s21  ;;  %p1308_p5 = scmp.lt.u32.totalorder %s1304_s21, %s1527_s7 }
  0x48   :  { %p1310_p6 = pnand %p1308_p5, %p1305_p4 }
  0x4a   :  { %1313 = shalt.err (!%p1310_p6)
}
  0x4b   :  { %s1314_s24 = scalar_lea.vmem %s76_s30, 2048  ;;  %p1319_p8 = scmp.lt.s32.totalorder %s76_s30, %s76_s30 }
  0x4c   :  { %p1315_p7 = scmp.ne.s32.totalorder %s76_s30, %s1314_s24  ;;  %p1320_p9 = scmp.lt.s32.totalorder %s1314_s24, %s1314_s24 }
  0x4e   :  { %p1321_p10 = por %p1320_p9, %p1319_p8 }
  0x50   :  { %p1322_p11 = pnand %p1321_p10, %p1315_p7 }
  0x52   :  { %1325 = shalt.err (!%p1322_p11)
}
  0x53   :  { %s1363_s3 = smov 64   ;;  %s1364_s19 = smov 4  }
  0x54   :  { %81 = dma.hbm_to_vmem [thread:$0]  %s1527_s7, 2048, %s76_s30, [#allocation9], %s1363_s3, %s1363_s3, %s1364_s19  }
  0x55   :  { %1348 = dma.done.wait [#allocation3], 64  }
  0x56   :  { %1349 = vsyncadd [#allocation3], 4294967232 }
  0x57   :  { %1350 = dma.done.wait [#allocation6], 6144  }
  0x58   :  { %1351 = vsyncadd [#allocation6], 4294961152 }
  0x59   :  { %1352 = dma.done.wait [#allocation9], 6144  }
  0x5a   :  { %1353 = vsyncadd [#allocation9], 4294961152  ;;  %v1365_v0 = vmov 0   ;;  %v1076_v1 = vld [vmem:[#allocation5 + $0x4] ss:$8 sps:$4 sm:$0xff]  }
  0x5b   :  { %241 = vmatprep.mubr.bf16.mxu0 %v1365_v0  ;;  %v1078_v2 = vld [vmem:[#allocation5] ss:$8 sps:$4 sm:$0xff]   ;;  %209 = vmatprep.subr.bf16.mxu0 %v1076_v1  ;;  %v1079_v3 = vld [vmem:[#allocation5 + $0x14] ss:$8 sps:$4 sm:$0xff]   ;;  %v1081_v4 = vld [vmem:[#allocation5 + $0x10] ss:$8 sps:$4 sm:$0xff]  }
  0x5c   :  { %210 = vmatpush1.bf16.msra.mxu0 %v1078_v2  ;;  %v1082_v5 = vld [vmem:[#allocation5 + $0x24] ss:$8 sps:$4 sm:$0xff]   ;;  %v1084_v6 = vld [vmem:[#allocation5 + $0x20] ss:$8 sps:$4 sm:$0xff]   ;;  %v1085_v7 = vld [vmem:[#allocation5 + $0x34] ss:$8 sps:$4 sm:$0xff]  }
  0x5d   :  { %211 = vmatprep.subr.bf16.mxu0 %v1079_v3  ;;  %v1087_v8 = vld [vmem:[#allocation5 + $0x30] ss:$8 sps:$4 sm:$0xff]   ;;  %v1088_v9 = vld [vmem:[#allocation5 + $0x44] ss:$8 sps:$4 sm:$0xff]   ;;  %v1102_v11 = vld [vmem:[#allocation7] ss:$8 sps:$4 sm:$0xff]  }
  0x5e   :  { %v1100_v10 = vld [vmem:[#allocation7 + $0x4] ss:$8 sps:$4 sm:$0xff]   ;;  %v1103_v12 = vld [vmem:[#allocation7 + $0x14] ss:$8 sps:$4 sm:$0xff]   ;;  %v1090_v13 = vld [vmem:[#allocation5 + $0x40] ss:$8 sps:$4 sm:$0xff]  }
  0x5f   :  { %456 = vmatprep.subr.bf16.mxu1 %v1100_v10  ;;  %v1105_v14 = vld [vmem:[#allocation7 + $0x10] ss:$8 sps:$4 sm:$0xff]   ;;  %v1106_v15 = vld [vmem:[#allocation7 + $0x24] ss:$8 sps:$4 sm:$0xff]   ;;  %v1091_v16 = vld [vmem:[#allocation5 + $0x54] ss:$8 sps:$4 sm:$0xff]  }
  0x60   :  { %212 = vmatpush1.bf16.msra.mxu0 %v1081_v4  ;;  %457 = vmatpush1.bf16.msra.mxu1 %v1102_v11  ;;  %v1093_v17 = vld [vmem:[#allocation5 + $0x50] ss:$8 sps:$4 sm:$0xff]   ;;  %v1108_v18 = vld [vmem:[#allocation7 + $0x20] ss:$8 sps:$4 sm:$0xff]   ;;  %v1109_v19 = vld [vmem:[#allocation7 + $0x34] ss:$8 sps:$4 sm:$0xff]  }
  0x61   :  { %213 = vmatprep.subr.bf16.mxu0 %v1082_v5  ;;  %458 = vmatprep.subr.bf16.mxu1 %v1103_v12  ;;  %v1094_v20 = vld [vmem:[#allocation5 + $0x64] ss:$8 sps:$4 sm:$0xff]   ;;  %v1096_v21 = vld [vmem:[#allocation5 + $0x60] ss:$8 sps:$4 sm:$0xff]   ;;  %v1111_v22 = vld [vmem:[#allocation7 + $0x30] ss:$8 sps:$4 sm:$0xff]  }
  0x62   :  { %v1112_v23 = vld [vmem:[#allocation7 + $0x44] ss:$8 sps:$4 sm:$0xff]   ;;  %v1097_v24 = vld [vmem:[#allocation5 + $0x74] ss:$8 sps:$4 sm:$0xff]   ;;  %v1099_v25 = vld [vmem:[#allocation5 + $0x70] ss:$8 sps:$4 sm:$0xff]  }
  0x63   :  { %v1114_v26 = vld [vmem:[#allocation7 + $0x40] ss:$8 sps:$4 sm:$0xff]   ;;  %v1115_v27 = vld [vmem:[#allocation7 + $0x54] ss:$8 sps:$4 sm:$0xff]   ;;  %v1117_v29 = vld [vmem:[#allocation7 + $0x50] ss:$8 sps:$4 sm:$0xff]  }
  0x64   :  { %214 = vmatpush1.bf16.msra.mxu0 %v1084_v6  ;;  %459 = vmatpush1.bf16.msra.mxu1 %v1105_v14  ;;  %v100_v28 = vld [vmem:[#allocation2] sm:$0xf]  ;;  %v1118_v30 = vld [vmem:[#allocation7 + $0x64] ss:$8 sps:$4 sm:$0xff]   ;;  %v1120_v31 = vld [vmem:[#allocation7 + $0x60] ss:$8 sps:$4 sm:$0xff]  }
  0x65   :  { %215 = vmatprep.subr.bf16.mxu0 %v1085_v7  ;;  %460 = vmatprep.subr.bf16.mxu1 %v1106_v15  ;;  %v1121_v32 = vld [vmem:[#allocation7 + $0x74] ss:$8 sps:$4 sm:$0xff]   ;;  %v1123_v33 = vld [vmem:[#allocation7 + $0x70] ss:$8 sps:$4 sm:$0xff]   ;;  %v1124_v34 = vld [vmem:[#allocation7 + $0x84] ss:$8 sps:$4 sm:$0xff]  }
  0x66   :  { %v1126_v35 = vld [vmem:[#allocation7 + $0x80] ss:$8 sps:$4 sm:$0xff]   ;;  %v1127_v36 = vld [vmem:[#allocation7 + $0x94] ss:$8 sps:$4 sm:$0xff]   ;;  %v1129_v37 = vld [vmem:[#allocation7 + $0x90] ss:$8 sps:$4 sm:$0xff]  }
  0x67   :  { %v1130_v38 = vld [vmem:[#allocation7 + $0xa4] ss:$8 sps:$4 sm:$0xff]   ;;  %v1132_v39 = vld [vmem:[#allocation7 + $0xa0] ss:$8 sps:$4 sm:$0xff]   ;;  %v1133_v40 = vld [vmem:[#allocation7 + $0xb4] ss:$8 sps:$4 sm:$0xff]  }
  0x68   :  { %216 = vmatpush1.bf16.msra.mxu0 %v1087_v8  ;;  %461 = vmatpush1.bf16.msra.mxu1 %v1108_v18  ;;  %v1135_v41 = vld [vmem:[#allocation7 + $0xb0] ss:$8 sps:$4 sm:$0xff]   ;;  %v1136_v42 = vld [vmem:[#allocation7 + $0xc4] ss:$8 sps:$4 sm:$0xff]   ;;  %v1138_v43 = vld [vmem:[#allocation7 + $0xc0] ss:$8 sps:$4 sm:$0xff]  }
  0x69   :  { %217 = vmatprep.subr.bf16.mxu0 %v1088_v9  ;;  %462 = vmatprep.subr.bf16.mxu1 %v1109_v19  ;;  %v1139_v44 = vld [vmem:[#allocation7 + $0xd4] ss:$8 sps:$4 sm:$0xff]   ;;  %v1141_v45 = vld [vmem:[#allocation7 + $0xd0] ss:$8 sps:$4 sm:$0xff]   ;;  %v1142_v46 = vld [vmem:[#allocation7 + $0xe4] ss:$8 sps:$4 sm:$0xff]  }
  0x6a   :  { %v1144_v47 = vld [vmem:[#allocation7 + $0xe0] ss:$8 sps:$4 sm:$0xff]   ;;  %v1145_v48 = vld [vmem:[#allocation7 + $0xf4] ss:$8 sps:$4 sm:$0xff]   ;;  %v1147_v49 = vld [vmem:[#allocation7 + $0xf0] ss:$8 sps:$4 sm:$0xff]  }
  0x6b   :  { %v1148_v50 = vld [vmem:[#allocation8] ss:$8 sps:$4 sm:$0xff]   ;;  %v1150_v51 = vld [vmem:[#allocation8 + $0x4] ss:$8 sps:$4 sm:$0xff]   ;;  %v1153_v52 = vld [vmem:[#allocation8 + $0x14] ss:$8 sps:$4 sm:$0xff]  }
  0x6c   :  { %218 = vmatpush1.bf16.msra.mxu0 %v1090_v13  ;;  %463 = vmatpush1.bf16.msra.mxu1 %v1111_v22  ;;  %v1151_v53 = vld [vmem:[#allocation8 + $0x10] ss:$8 sps:$4 sm:$0xff]   ;;  %v1156_v54 = vld [vmem:[#allocation8 + $0x24] ss:$8 sps:$4 sm:$0xff]   ;;  %v1154_v55 = vld [vmem:[#allocation8 + $0x20] ss:$8 sps:$4 sm:$0xff]  }
  0x6d   :  { %219 = vmatprep.subr.bf16.mxu0 %v1091_v16  ;;  %464 = vmatprep.subr.bf16.mxu1 %v1112_v23  ;;  %v1159_v56 = vld [vmem:[#allocation8 + $0x34] ss:$8 sps:$4 sm:$0xff]   ;;  %v1157_v57 = vld [vmem:[#allocation8 + $0x30] ss:$8 sps:$4 sm:$0xff]   ;;  %v1162_v58 = vld [vmem:[#allocation8 + $0x44] ss:$8 sps:$4 sm:$0xff]   ;;  %v119_v16 = vlaneseq }
  0x6e   :  { %v1160_v59 = vld [vmem:[#allocation8 + $0x40] ss:$8 sps:$4 sm:$0xff]   ;;  %v1165_v60 = vld [vmem:[#allocation8 + $0x54] ss:$8 sps:$4 sm:$0xff]   ;;  %v1163_v61 = vld [vmem:[#allocation8 + $0x50] ss:$8 sps:$4 sm:$0xff]  }
  0x6f   :  { %v1168_v62 = vld [vmem:[#allocation8 + $0x64] ss:$8 sps:$4 sm:$0xff]   ;;  %v1166_v63 = vld [vmem:[#allocation8 + $0x60] ss:$8 sps:$4 sm:$0xff]   ;;  %v1171_v0 = vld [vmem:[#allocation8 + $0x74] ss:$8 sps:$4 sm:$0xff]  }
  0x70   :  { %220 = vmatpush1.bf16.msra.mxu0 %v1093_v17  ;;  %465 = vmatpush1.bf16.msra.mxu1 %v1114_v26  ;;  %v1169_v1 = vld [vmem:[#allocation8 + $0x70] ss:$8 sps:$4 sm:$0xff]   ;;  %v1174_v2 = vld [vmem:[#allocation8 + $0x84] ss:$8 sps:$4 sm:$0xff]   ;;  %v1172_v3 = vld [vmem:[#allocation8 + $0x80] ss:$8 sps:$4 sm:$0xff]  }
  0x71   :  { %221 = vmatprep.subr.bf16.mxu0 %v1094_v20  ;;  %466 = vmatprep.subr.bf16.mxu1 %v1115_v27  ;;  %v1177_v4 = vld [vmem:[#allocation8 + $0x94] ss:$8 sps:$4 sm:$0xff]   ;;  %v1175_v5 = vld [vmem:[#allocation8 + $0x90] ss:$8 sps:$4 sm:$0xff]   ;;  %v1180_v6 = vld [vmem:[#allocation8 + $0xa4] ss:$8 sps:$4 sm:$0xff]  }
  0x72   :  { %v1178_v7 = vld [vmem:[#allocation8 + $0xa0] ss:$8 sps:$4 sm:$0xff]   ;;  %v1183_v8 = vld [vmem:[#allocation8 + $0xb4] ss:$8 sps:$4 sm:$0xff]   ;;  %v1181_v9 = vld [vmem:[#allocation8 + $0xb0] ss:$8 sps:$4 sm:$0xff]  }
  0x73   :  { %v1186_v10 = vld [vmem:[#allocation8 + $0xc4] ss:$8 sps:$4 sm:$0xff]   ;;  %v1184_v11 = vld [vmem:[#allocation8 + $0xc0] ss:$8 sps:$4 sm:$0xff]   ;;  %v1189_v12 = vld [vmem:[#allocation8 + $0xd4] ss:$8 sps:$4 sm:$0xff]  }
  0x74   :  { %222 = vmatpush1.bf16.msra.mxu0 %v1096_v21  ;;  %467 = vmatpush1.bf16.msra.mxu1 %v1117_v29  ;;  %v1187_v13 = vld [vmem:[#allocation8 + $0xd0] ss:$8 sps:$4 sm:$0xff]   ;;  %v1192_v14 = vld [vmem:[#allocation8 + $0xe4] ss:$8 sps:$4 sm:$0xff]   ;;  %v1190_v15 = vld [vmem:[#allocation8 + $0xe0] ss:$8 sps:$4 sm:$0xff]  }
  0x75   :  { %223 = vmatprep.subr.bf16.mxu0 %v1097_v24  ;;  %468 = vmatprep.subr.bf16.mxu1 %v1118_v30  ;;  %v120_v17 = vshrl.u32 %v119_v16, 7  ;;  %v117_v19 = vld [vmem:[%s1522_s2] sm:$0x3] }
  0x77   :  { %v1486_v18 = vsub.s32 0, %v120_v17  ;;  %v1491_v20 = vsub.s32 1, %v120_v17 }
  0x78   :  { %224 = vmatpush1.bf16.msra.mxu0 %v1099_v25  ;;  %469 = vmatpush1.bf16.msra.mxu1 %v1120_v31  ;;  %v1195_v31 = vld [vmem:[#allocation8 + $0xf4] ss:$8 sps:$4 sm:$0xff]  }
  0x79   :  { %470 = vmatprep.subr.bf16.mxu1 %v1121_v32  ;;  %703 = vmatprep.subr.bf16.mxu0 %v1150_v51  ;;  %v122_v21 = vrot.slane %v117_v19, %v1486_v18  ;;  %v126_v22 = vrot.slane %v117_v19, %v1491_v20  ;;  %v1193_v32 = vld [vmem:[#allocation8 + $0xf0] ss:$8 sps:$4 sm:$0xff]  }
  0x7b   :  { %242 = vmatmul.mubr.bf16.vlgmr.msra.gmra.mrb[0].mxu0 %v100_v28 }
  0x7c   :  { %471 = vmatpush1.bf16.msra.mxu1 %v1123_v33  ;;  %704 = vmatpush1.bf16.msra.mxu0 %v1148_v50  ;;  %v1196_v33 = vld [vmem:[#allocation10 + $0x40] sm:$0xff]  }
  0x7d   :  { %472 = vmatprep.subr.bf16.mxu1 %v1124_v34  ;;  %705 = vmatprep.subr.bf16.mxu0 %v1153_v52  ;;  %v1197_v34 = vld [vmem:[#allocation10] sm:$0xff]  }
  0x80   :  { %473 = vmatpush1.bf16.msra.mxu1 %v1126_v35  ;;  %706 = vmatpush1.bf16.msra.mxu0 %v1151_v53  ;;  %v1198_v35 = vld [vmem:[#allocation10 + $0x48] sm:$0xff]  }
  0x81   :  { %474 = vmatprep.subr.bf16.mxu1 %v1127_v36  ;;  %707 = vmatprep.subr.bf16.mxu0 %v1156_v54  ;;  %v1199_v36 = vld [vmem:[#allocation10 + $0x8] sm:$0xff]  }
  0x84   :  { %475 = vmatpush1.bf16.msra.mxu1 %v1129_v37  ;;  %708 = vmatpush1.bf16.msra.mxu0 %v1154_v55  ;;  %v1200_v37 = vld [vmem:[#allocation10 + $0x50] sm:$0xff]  }
  0x85   :  { %476 = vmatprep.subr.bf16.mxu1 %v1130_v38  ;;  %709 = vmatprep.subr.bf16.mxu0 %v1159_v56  ;;  %v1201_v38 = vld [vmem:[#allocation10 + $0x10] sm:$0xff]  }
  0x88   :  { %477 = vmatpush1.bf16.msra.mxu1 %v1132_v39  ;;  %710 = vmatpush1.bf16.msra.mxu0 %v1157_v57  ;;  %v1202_v39 = vld [vmem:[#allocation10 + $0x58] sm:$0xff]   ;;  %v1209_v57 = vld [vmem:[#allocation10 + $0x30] sm:$0xff]  }
  0x89   :  { %478 = vmatprep.subr.bf16.mxu1 %v1133_v40  ;;  %711 = vmatprep.subr.bf16.mxu0 %v1162_v58  ;;  %v1203_v40 = vld [vmem:[#allocation10 + $0x18] sm:$0xff]  }
  0x8a   :  { %v1210_v58 = vld [vmem:[#allocation10 + $0x78] sm:$0xff]  }
  0x8c   :  { %479 = vmatpush1.bf16.msra.mxu1 %v1135_v41  ;;  %712 = vmatpush1.bf16.msra.mxu0 %v1160_v59  ;;  %v1204_v41 = vld [vmem:[#allocation10 + $0x60] sm:$0xff]   ;;  %v1211_v59 = vld [vmem:[#allocation10 + $0x38] sm:$0xff]  }
  0x8d   :  { %480 = vmatprep.subr.bf16.mxu1 %v1136_v42  ;;  %713 = vmatprep.subr.bf16.mxu0 %v1165_v60  ;;  %v1205_v42 = vld [vmem:[#allocation10 + $0x20] sm:$0xff]   ;;  %v531_v60 = vld [vmem:[%s1526_s6] sm:$0x3]  ;;  %s1366_s6 = smov [#allocation11]  }
  0x8e   :  { %s934_s13 = sshll.u32 %s1366_s6, 4  ;;  %s935_s13 = int_to_ptr.vmem [resolvable:$true] %s934_s13 }
  0x8f   :  { %s1326_s1 = scalar_lea.vmem %s935_s13, 128  ;;  %p1331_p13 = scmp.lt.s32.totalorder %s935_s13, %s935_s13 }
  0x90   :  { %481 = vmatpush1.bf16.msra.mxu1 %v1138_v43  ;;  %714 = vmatpush1.bf16.msra.mxu0 %v1163_v61  ;;  %v1206_v43 = vld [vmem:[#allocation10 + $0x68] sm:$0xff]   ;;  %v536_v61 = vrot.slane %v531_v60, %v1486_v18  ;;  %p1327_p12 = scmp.ne.s32.totalorder %s935_s13, %s1326_s1  ;;  %p1332_p0 = scmp.lt.s32.totalorder %s1326_s1, %s1326_s1 }
  0x91   :  { %482 = vmatprep.subr.bf16.mxu1 %v1139_v44  ;;  %715 = vmatprep.subr.bf16.mxu0 %v1168_v62  ;;  %v1207_v44 = vld [vmem:[#allocation10 + $0x28] sm:$0xff]   ;;  %v540_v62 = vrot.slane %v531_v60, %v1491_v20 }
  0x92   :  { %p1333_p1 = por %p1332_p0, %p1331_p13 }
  0x94   :  { %483 = vmatpush1.bf16.msra.mxu1 %v1141_v45  ;;  %716 = vmatpush1.bf16.msra.mxu0 %v1166_v63  ;;  %v1208_v45 = vld [vmem:[#allocation10 + $0x70] sm:$0xff]   ;;  %p1334_p2 = pnand %p1333_p1, %p1327_p12 }
  0x95   :  { %484 = vmatprep.subr.bf16.mxu1 %v1142_v46  ;;  %717 = vmatprep.subr.bf16.mxu0 %v1171_v0  ;;  %v284_v46 = vld [vmem:[%s1524_s4] sm:$0x3] }
  0x98   :  { %485 = vmatpush1.bf16.msra.mxu1 %v1144_v47  ;;  %718 = vmatpush1.bf16.msra.mxu0 %v1169_v1  ;;  %v289_v47 = vrot.slane %v284_v46, %v1486_v18 }
  0x99   :  { %486 = vmatprep.subr.bf16.mxu1 %v1145_v48  ;;  %719 = vmatprep.subr.bf16.mxu0 %v1174_v2  ;;  %v293_v48 = vrot.slane %v284_v46, %v1491_v20 }
  0x9c   :  { %487 = vmatpush1.bf16.msra.mxu1 %v1147_v49  ;;  %720 = vmatpush1.bf16.msra.mxu0 %v1172_v3 }
  0x9d   :  { %721 = vmatprep.subr.bf16.mxu0 %v1177_v4  ;;  %1043 = vmatprep.subr.bf16.mxu1 %v1196_v33 }
  0xa0   :  { %722 = vmatpush1.bf16.msra.mxu0 %v1175_v5 }
  0xa1   :  { %723 = vmatprep.subr.bf16.mxu0 %v1180_v6 }
  0xa4   :  { %724 = vmatpush1.bf16.msra.mxu0 %v1178_v7 }
  0xa5   :  { %725 = vmatprep.subr.bf16.mxu0 %v1183_v8  ;;  %v1025_v8 = vld [vmem:[%s1528_s8] ss:$0 sm:$0xff] }
  0xa8   :  { %726 = vmatpush1.bf16.msra.mxu0 %v1181_v9 }
  0xa9   :  { %727 = vmatprep.subr.bf16.mxu0 %v1186_v10 }
  0xac   :  { %728 = vmatpush1.bf16.msra.mxu0 %v1184_v11 }
  0xad   :  { %729 = vmatprep.subr.bf16.mxu0 %v1189_v12 }
  0xb0   :  { %730 = vmatpush1.bf16.msra.mxu0 %v1187_v13 }
  0xb1   :  { %731 = vmatprep.subr.bf16.mxu0 %v1192_v14 }
  0xb4   :  { %732 = vmatpush1.bf16.msra.mxu0 %v1190_v15 }
  0xb5   :  { %733 = vmatprep.subr.bf16.mxu0 %v1195_v31 }
  0xb8   :  { %734 = vmatpush1.bf16.msra.mxu0 %v1193_v32 }
 0x14e   :  { %v243_v23 = vpop.f32.mrb[0].mxu0 }
 0x14f   :  { %v244_v24 = vadd.f32 %v243_v23, %v122_v21  ;;  %v245_v25 = vpop.f32.mrb[1].mxu0 }
 0x150   :  { %v247_v26 = vpop.f32.mrb[2].mxu0  ;;  %v246_v27 = vadd.f32 %v245_v25, %v126_v22 }
 0x151   :  { %v248_v28 = vpop.f32.mrb[3].mxu0  ;;  %v250_v30 = vpack.c.bf16 %v244_v24, %v244_v24 }
 0x152   :  { %v251_v29 = vpack.c.bf16 %v246_v27, %v246_v27 }
 0x154   :  { %488 = vmatprep.mubr.bf16.mxu1 %v251_v29 }
 0x155   :  { %489 = vmatmul.mubr.bf16.vlgmr.msra.gmra.mrb[0].mxu1 %v250_v30 }
 0x156   :  { %1044 = vmatpush3.bf16.msra.mxu1 %v1197_v34 }
 0x157   :  { %1045 = vmatprep.subr.bf16.mxu1 %v1198_v35 }
 0x15a   :  { %1046 = vmatpush3.bf16.msra.mxu1 %v1199_v36 }
 0x15b   :  { %1047 = vmatprep.subr.bf16.mxu1 %v1200_v37 }
 0x15e   :  { %1048 = vmatpush3.bf16.msra.mxu1 %v1201_v38 }
 0x15f   :  { %1049 = vmatprep.subr.bf16.mxu1 %v1202_v39 }
 0x162   :  { %1050 = vmatpush3.bf16.msra.mxu1 %v1203_v40 }
 0x163   :  { %1051 = vmatprep.subr.bf16.mxu1 %v1204_v41 }
 0x166   :  { %1052 = vmatpush3.bf16.msra.mxu1 %v1205_v42 }
 0x167   :  { %1053 = vmatprep.subr.bf16.mxu1 %v1206_v43 }
 0x16a   :  { %1054 = vmatpush3.bf16.msra.mxu1 %v1207_v44 }
 0x16b   :  { %1055 = vmatprep.subr.bf16.mxu1 %v1208_v45 }
 0x16e   :  { %1056 = vmatpush3.bf16.msra.mxu1 %v1209_v57 }
 0x16f   :  { %1057 = vmatprep.subr.bf16.mxu1 %v1210_v58 }
 0x172   :  { %1058 = vmatpush3.bf16.msra.mxu1 %v1211_v59 }
 0x228   :  { %v490_v49 = vpop.f32.mrb[0].mxu1 }
 0x229   :  { %v491_v50 = vadd.f32 %v490_v49, %v289_v47  ;;  %v492_v51 = vpop.f32.mrb[1].mxu1 }
 0x22a   :  { %v493_v52 = vadd.f32 %v492_v51, %v293_v48  ;;  %v494_v53 = vpop.f32.mrb[2].mxu1 }
 0x22b   :  { %v495_v54 = vpop.f32.mrb[3].mxu1  ;;  %v497_v56 = vpack.c.bf16 %v491_v50, %v491_v50 }
 0x22c   :  { %v498_v55 = vpack.c.bf16 %v493_v52, %v493_v52 }
 0x22e   :  { %735 = vmatprep.mubr.bf16.mxu0 %v498_v55 }
 0x22f   :  { %736 = vmatmul.mubr.bf16.vlgmr.msra.gmra.mrb[4].mxu0 %v497_v56 }
 0x302   :  { %v737_v63 = vpop.f32.mrb[4].mxu0 }
 0x303   :  { %v738_v0 = vadd.f32 %v737_v63, %v536_v61  ;;  %v739_v1 = vpop.f32.mrb[5].mxu0 }
 0x304   :  { %v740_v2 = vadd.f32 %v739_v1, %v540_v62  ;;  %v741_v3 = vpop.f32.mrb[6].mxu0 }
 0x305   :  { %v742_v4 = vpop.f32.mrb[7].mxu0  ;;  %v744_v6 = vpack.c.bf16 %v738_v0, %v738_v0 }
 0x306   :  { %v745_v5 = vpack.c.bf16 %v740_v2, %v740_v2 }
 0x308   :  { %913 = vmatprep.mubr.bf16.mxu1 %v745_v5 }
 0x309   :  { %914 = vmatmul.mubr.bf16.vlgmr.msra.gmra.mrb[4].mxu1 %v744_v6 }
 0x3dc   :  { %v1059_v7 = vpop.f32.mrb[4].mxu1 }
 0x3dd   :  { %v1060_v9 = vpop.f32.mrb[5].mxu1 }
 0x3de   :  { %v1061_v10 = vadd.f32 %v1060_v9, %v1059_v7  ;;  %v1062_v11 = vpop.f32.mrb[6].mxu1 }
 0x3df   :  { %v1063_v12 = vpop.f32.mrb[7].mxu1 }
 0x3e0   :  { %v916_v13 = vadd.f32 %v1061_v10, %v1025_v8 }
 0x3e2   :  { %v1042_v14 = vmul.f32 -1.442695, %v916_v13 }
 0x3e4   :  { %1212 = vpow2.f32 %v1042_v14 }
 0x3ee   :  { %v1213_v15 = vpop.eup %1212 }
 0x3ef   :  { %v924_v16 = vadd.f32 1.0, %v1213_v15 }
 0x3f1   :  { %1214 = vrcp.f32 %v924_v16 }
 0x3fb   :  { %v1215_v17 = vpop.eup %1214 }
 0x3fc   :  { %927 = vst [vmem:[#allocation11] sm:$0xff] %v1215_v17 }
 0x3fd   :  { %1337 = shalt.err (!%p1334_p2)
}
 0x3fe   :  { %s1338_s14 = scalar_lea.hbm %s1529_s9, 128 }
 0x3ff   :  { %p1339_p3 = scmp.ne.s32.totalorder %s1529_s9, %s1338_s14  ;;  %p1342_p4 = scmp.lt.u32.totalorder %s1338_s14, %s1529_s9 }
 0x401   :  { %p1344_p5 = pnand %p1342_p4, %p1339_p3 }
 0x403   :  { %1347 = shalt.err (!%p1344_p5)
}
 0x404   :  { %937 = dma.vmem_to_hbm [thread:$0]  %s935_s13, 128, %s1529_s9, [#allocation4]  }
 0x405   :  { %1354 = dma.done.wait [#allocation4], 128  }
 0x406   :  { %1355 = vsyncadd [#allocation4], 4294967168 }
 0x407   :  { %941 = vsyncpa [#allocation3], 1 }
 0x408   :  { %942 = vsyncpa [#allocation6], 1 }
 0x409   :  { %943 = vsyncpa [#allocation9], 1 }
 0x40a   :  { %944 = vsyncpa [#allocation4], 1 }

</bundles_post_ra>
